<compile_context>
chip_gen: v5e
topology: v5e:2x2
jax: 0.10.0
libtpu: 0.0.40
codegen_flags: <defaults>
</compile_context>

<pallas_src>
import functools

import jax
import jax.numpy as jnp
from jax.experimental import pallas as pl
from jax.experimental.pallas import tpu as pltpu

_LANE = 128      # f32 lane width of a vreg
_SUBLANE = 8     # f32 sublane count of a vreg


def _round_up(x, m):
    return (x + m - 1) // m * m


def _leaky_relu(x, negative_slope=0.01):
    # PyTorch nn.LeakyReLU default negative_slope = 0.01.
    # max(x, 0.01*x) == LeakyReLU(x) and is one fewer VPU op than where/select.
    return jnp.maximum(x, negative_slope * x)


def mlp_encoder_kernel(obs_ref, w1_ref, b1_ref, w2_ref, b2_ref, w3_ref, b3_ref,
                       out_ref, *, max_norm, normalize):
    x = obs_ref[...]

    # Linear 1 + LeakyReLU
    h = jnp.dot(x, w1_ref[...], preferred_element_type=jnp.float32) + b1_ref[...]
    h = _leaky_relu(h)

    # Linear 2 + LeakyReLU
    h = jnp.dot(h, w2_ref[...], preferred_element_type=jnp.float32) + b2_ref[...]
    h = _leaky_relu(h)

    # Linear 3
    h = jnp.dot(h, w3_ref[...], preferred_element_type=jnp.float32) + b3_ref[...]

    if (max_norm is not None) and normalize:
        sq = jnp.sum(h * h, axis=-1, keepdims=True)
        # rsqrt lives on the EUP (separate VLIW slot); sq == 0 gives inf and
        # min(inf, 1) == 1, matching (norm / max_norm).clamp(min=1).
        scale = jnp.minimum(jnp.float32(max_norm) * jax.lax.rsqrt(sq), 1.0)
        h = h * scale

    out_ref[...] = h.astype(out_ref.dtype)


def _tile_defaults():
    """(block_m, min_grid_steps) tuned per TPU generation.

    v7x: ~3.2 TB/s HBM shared by 2 TCs -> much larger tiles to amortize the
    ~0.35 us/step overhead, but keep >=4 grid steps (>=2 per TensorCore) so
    the parallel batch axis still shards across cores and DMA stays pipelined.
    v5e/v6e: 1024-row tiles already sit near the HBM roofline.
    """
    try:
        kind = jax.devices()[0].device_kind.lower()
        if "v7" in kind:
            return 4096, 4
    except Exception:
        pass
    return 1024, 1


def mlp_encoder_forward(obs, params, *, max_norm=None, normalize=True,
                        block_m=None, min_grid_steps=None,
                        out_dtype=jnp.float32):
    """obs: (B, obs_dim) f32. params: dict with w1t,b1,w2t,b2,w3t,b3.

    Weights wNt are stored pre-transposed as (in_dim, out_dim); biases are
    (1, out_dim). No per-call reformatting of parameters is performed.
    Returns (B, feature_dim) in out_dtype (default f32; pass bf16 to halve
    the dominant write stream if downstream numerics allow).
    """
    B, obs_dim = obs.shape
    feature_dim = params["w3t"].shape[1]

    def_bm, def_ms = _tile_defaults()
    if block_m is None:
        block_m = def_bm
    if min_grid_steps is None:
        min_grid_steps = def_ms
    # Correctness: the batch tile (second-to-last dim of every block) must be
    # a multiple of the f32 sublane count.
    block_m = max(_SUBLANE, _round_up(block_m, _SUBLANE))

    # Balanced tiling: pick the number of steps implied by block_m, then
    # spread B evenly so b_pad - B stays small (instead of padding B up to a
    # full block_m multiple).
    n_steps = pl.cdiv(B, block_m)
    if min_grid_steps > 1 and B >= min_grid_steps * _SUBLANE:
        n_steps = max(n_steps, min_grid_steps)
    tm = _round_up(pl.cdiv(B, n_steps), _SUBLANE)

    b_pad = _round_up(B, tm)
    if b_pad != B:
        obs = jnp.pad(obs, ((0, b_pad - B), (0, 0)))

    kernel = functools.partial(
        mlp_encoder_kernel, max_norm=max_norm, normalize=normalize)

    # Weights/biases: constant index_map -> VMEM-resident across grid steps.
    resident = lambda arr: pl.BlockSpec(arr.shape, lambda i: (0, 0))

    out = pl.pallas_call(
        kernel,
        out_shape=jax.ShapeDtypeStruct((b_pad, feature_dim), out_dtype),
        grid=(b_pad // tm,),
        in_specs=[
            pl.BlockSpec((tm, obs_dim), lambda i: (i, 0)),
            resident(params["w1t"]), resident(params["b1"]),
            resident(params["w2t"]), resident(params["b2"]),
            resident(params["w3t"]), resident(params["b3"]),
        ],
        out_specs=pl.BlockSpec((tm, feature_dim), lambda i: (i, 0)),
        compiler_params=pltpu.CompilerParams(
            # Batch axis is independent -> shard across v7x's 2 TCs; harmless
            # on single-TC v5e/v6e. With 32-wide I/O even tm=4096 uses only a
            # few MiB of double-buffered VMEM, so no vmem_limit_bytes override
            # is needed on any generation.
            dimension_semantics=("parallel",),
        ),
    )(obs, params["w1t"], params["b1"], params["w2t"], params["b2"],
      params["w3t"], params["b3"])

    if b_pad != B:
        out = out[:B]
    return out


def init_params(key, obs_dim, feature_dim):
    """One-time parameter preparation. Deterministic init mimicking PyTorch
    nn.Linear defaults (uniform(-1/sqrt(fan_in), 1/sqrt(fan_in))); weights are
    stored pre-transposed as (in_dim, out_dim) so no per-call reformatting is
    needed."""
    keys = jax.random.split(key, 6)

    def linear(kw, kb, fan_in, fan_out):
        bound = 1.0 / jnp.sqrt(jnp.float32(fan_in))
        wt = jax.random.uniform(kw, (fan_in, fan_out), jnp.float32, -bound, bound)
        b = jax.random.uniform(kb, (1, fan_out), jnp.float32, -bound, bound)
        return wt, b

    w1t, b1 = linear(keys[0], keys[1], obs_dim, feature_dim)
    w2t, b2 = linear(keys[2], keys[3], feature_dim, feature_dim)
    w3t, b3 = linear(keys[4], keys[5], feature_dim, feature_dim)
    return dict(w1t=w1t, b1=b1, w2t=w2t, b2=b2, w3t=w3t, b3=b3)


def reference_forward(obs, params, *, max_norm=None, normalize=True):
    def lrelu(x):
        return jnp.where(x > 0, x, 0.01 * x)
    h = lrelu(obs @ params["w1t"] + params["b1"])
    h = lrelu(h @ params["w2t"] + params["b2"])
    h = h @ params["w3t"] + params["b3"]
    if (max_norm is not None) and normalize:
        norms = jnp.linalg.norm(h, axis=-1, keepdims=True)
        h = h / jnp.maximum(norms / max_norm, 1.0)
    return h


if __name__ == "__main__":
    key = jax.random.PRNGKey(0)
    k_obs, k_params, k_obs_big = jax.random.split(key, 3)

    obs_dim = 32        # MLPEncoder obs_shape (flat observation dimension)
    feature_dim = 32
    max_norm = 1.0      # kwargs.get('max_norm')

    params = init_params(k_params, obs_dim, feature_dim)

    # Small batch (single tile).
    batch = 8
    obs = jax.random.normal(k_obs, (batch, obs_dim), jnp.float32)
    out = mlp_encoder_forward(obs, params, max_norm=max_norm, normalize=True)
    out = jax.block_until_ready(out)
    ref = reference_forward(obs, params, max_norm=max_norm, normalize=True)
    assert out.shape == (batch, feature_dim)
    assert jnp.allclose(out, ref, atol=1e-5, rtol=1e-5), "mismatch vs JAX reference"

    # Larger, non-multiple-of-tile batch: default tiling (balanced single tile
    # on v5e/v6e, >=4 steps on v7x) + batch-padding path.
    batch_big = 300
    obs_big = jax.random.normal(k_obs_big, (batch_big, obs_dim), jnp.float32)
    out_big = mlp_encoder_forward(obs_big, params, max_norm=max_norm,
                                  normalize=True)
    out_big = jax.block_until_ready(out_big)
    ref_big = reference_forward(obs_big, params, max_norm=max_norm,
                                normalize=True)
    assert out_big.shape == (batch_big, feature_dim)
    assert jnp.allclose(out_big, ref_big, atol=1e-5, rtol=1e-5), "mismatch (big batch)"

    # Small explicit block_m to exercise a multi-step pipelined grid with
    # resident weights, plus the normalize=False path.
    out_multi = mlp_encoder_forward(obs_big, params, max_norm=max_norm,
                                    normalize=False, block_m=64)
    out_multi = jax.block_until_ready(out_multi)
    ref_multi = reference_forward(obs_big, params, max_norm=max_norm,
                                  normalize=False)
    assert jnp.allclose(out_multi, ref_multi, atol=1e-5, rtol=1e-5), \
        "mismatch (multi-step grid)"

    # NOTE: `detach=True` in the PyTorch forward is an autograd concept
    # (jax.lax.stop_gradient in JAX) and does not affect forward values.
    print("KERNEL_OK")
</pallas_src>

<mosaic_0001>
module attributes {stable_mosaic.version = 11 : i64} {
  func.func @mlp_encoder_kernel(%arg0: i32, %arg1: memref<8x32xf32, #tpu.memory_space<vmem>>, %arg2: memref<32x32xf32, #tpu.memory_space<vmem>>, %arg3: memref<1x32xf32, #tpu.memory_space<vmem>>, %arg4: memref<32x32xf32, #tpu.memory_space<vmem>>, %arg5: memref<1x32xf32, #tpu.memory_space<vmem>>, %arg6: memref<32x32xf32, #tpu.memory_space<vmem>>, %arg7: memref<1x32xf32, #tpu.memory_space<vmem>>, %arg8: memref<8x32xf32, #tpu.memory_space<vmem>>) attributes {dimension_semantics = [#tpu.dimension_semantics<parallel>], iteration_bounds = array<i64: 1>, scalar_prefetch = 0 : i64, scratch_operands = 0 : i64, tpu.core_type = #tpu.core_type<tc>, window_params = [{transform_indices = @transform_0, window_bounds = array<i64: 8, 32>}, {pipeline_mode = #tpu.pipeline_mode<synchronous>, transform_indices = @transform_1, window_bounds = array<i64: 32, 32>}, {pipeline_mode = #tpu.pipeline_mode<synchronous>, transform_indices = @transform_2, window_bounds = array<i64: 1, 32>}, {pipeline_mode = #tpu.pipeline_mode<synchronous>, transform_indices = @transform_3, window_bounds = array<i64: 32, 32>}, {pipeline_mode = #tpu.pipeline_mode<synchronous>, transform_indices = @transform_4, window_bounds = array<i64: 1, 32>}, {pipeline_mode = #tpu.pipeline_mode<synchronous>, transform_indices = @transform_5, window_bounds = array<i64: 32, 32>}, {pipeline_mode = #tpu.pipeline_mode<synchronous>, transform_indices = @transform_6, window_bounds = array<i64: 1, 32>}, {transform_indices = @transform_7, window_bounds = array<i64: 8, 32>}]} {
    %c0 = arith.constant 0 : index
    %c0_0 = arith.constant 0 : index
    %0 = vector.load %arg1[%c0, %c0_0] : memref<8x32xf32, #tpu.memory_space<vmem>>, vector<8x32xf32>
    %c0_1 = arith.constant 0 : index
    %c0_2 = arith.constant 0 : index
    %1 = vector.load %arg2[%c0_1, %c0_2] : memref<32x32xf32, #tpu.memory_space<vmem>>, vector<32x32xf32>
    %cst = arith.constant dense<0.000000e+00> : vector<8x32xf32>
    %2 = tpu.matmul %0, %1, %cst {dimension_numbers = #tpu.dot_dimension_numbers<[1], [0], [0], [1], [0, 0, 1, 1], [], []>} : vector<8x32xf32>, vector<32x32xf32>, vector<8x32xf32> -> vector<8x32xf32>
    %c0_3 = arith.constant 0 : index
    %c0_4 = arith.constant 0 : index
    %3 = vector.load %arg3[%c0_3, %c0_4] : memref<1x32xf32, #tpu.memory_space<vmem>>, vector<1x32xf32>
    %4 = vector.broadcast %3 : vector<1x32xf32> to vector<8x32xf32>
    %5 = arith.addf %2, %4 : vector<8x32xf32>
    %cst_5 = arith.constant 0.00999999977 : f32
    %6 = vector.broadcast %cst_5 : f32 to vector<8x32xf32>
    %7 = arith.mulf %6, %5 : vector<8x32xf32>
    %8 = arith.maximumf %5, %7 : vector<8x32xf32>
    %c0_6 = arith.constant 0 : index
    %c0_7 = arith.constant 0 : index
    %9 = vector.load %arg4[%c0_6, %c0_7] : memref<32x32xf32, #tpu.memory_space<vmem>>, vector<32x32xf32>
    %cst_8 = arith.constant dense<0.000000e+00> : vector<8x32xf32>
    %10 = tpu.matmul %8, %9, %cst_8 {dimension_numbers = #tpu.dot_dimension_numbers<[1], [0], [0], [1], [0, 0, 1, 1], [], []>} : vector<8x32xf32>, vector<32x32xf32>, vector<8x32xf32> -> vector<8x32xf32>
    %c0_9 = arith.constant 0 : index
    %c0_10 = arith.constant 0 : index
    %11 = vector.load %arg5[%c0_9, %c0_10] : memref<1x32xf32, #tpu.memory_space<vmem>>, vector<1x32xf32>
    %12 = vector.broadcast %11 : vector<1x32xf32> to vector<8x32xf32>
    %13 = arith.addf %10, %12 : vector<8x32xf32>
    %cst_11 = arith.constant 0.00999999977 : f32
    %14 = vector.broadcast %cst_11 : f32 to vector<8x32xf32>
    %15 = arith.mulf %14, %13 : vector<8x32xf32>
    %16 = arith.maximumf %13, %15 : vector<8x32xf32>
    %c0_12 = arith.constant 0 : index
    %c0_13 = arith.constant 0 : index
    %17 = vector.load %arg6[%c0_12, %c0_13] : memref<32x32xf32, #tpu.memory_space<vmem>>, vector<32x32xf32>
    %cst_14 = arith.constant dense<0.000000e+00> : vector<8x32xf32>
    %18 = tpu.matmul %16, %17, %cst_14 {dimension_numbers = #tpu.dot_dimension_numbers<[1], [0], [0], [1], [0, 0, 1, 1], [], []>} : vector<8x32xf32>, vector<32x32xf32>, vector<8x32xf32> -> vector<8x32xf32>
    %c0_15 = arith.constant 0 : index
    %c0_16 = arith.constant 0 : index
    %19 = vector.load %arg7[%c0_15, %c0_16] : memref<1x32xf32, #tpu.memory_space<vmem>>, vector<1x32xf32>
    %20 = vector.broadcast %19 : vector<1x32xf32> to vector<8x32xf32>
    %21 = arith.addf %18, %20 : vector<8x32xf32>
    %22 = arith.mulf %21, %21 : vector<8x32xf32>
    %cst_17 = arith.constant dense<0.000000e+00> : vector<8xf32>
    %23 = vector.multi_reduction <add>, %22, %cst_17 [1] : vector<8x32xf32> to vector<8xf32>
    %24 = vector.shape_cast %23 : vector<8xf32> to vector<8x1xf32>
    %25 = math.rsqrt %24 : vector<8x1xf32>
    %cst_18 = arith.constant 1.000000e+00 : f32
    %26 = vector.broadcast %cst_18 : f32 to vector<8x1xf32>
    %27 = arith.mulf %26, %25 : vector<8x1xf32>
    %cst_19 = arith.constant 1.000000e+00 : f32
    %28 = vector.broadcast %cst_19 : f32 to vector<8x1xf32>
    %29 = arith.minimumf %27, %28 : vector<8x1xf32>
    %30 = vector.broadcast %29 : vector<8x1xf32> to vector<8x32xf32>
    %31 = arith.mulf %21, %30 : vector<8x32xf32>
    %c0_20 = arith.constant 0 : index
    %c0_21 = arith.constant 0 : index
    %32 = vector.load %arg8[%c0_20, %c0_21] : memref<8x32xf32, #tpu.memory_space<vmem>>, vector<8x32xf32>
    tpu.vector_store %arg8[%c0_20, %c0_21], %31 {strides = array<i32>} : memref<8x32xf32, #tpu.memory_space<vmem>>, vector<8x32xf32>,
    return
  }
  func.func @transform_0(%arg0: i32) -> (i32, i32) {
    %c0_i32 = arith.constant 0 : i32
    %c0_i32_0 = arith.constant 0 : i32
    return %arg0, %c0_i32 : i32, i32
  }
  func.func @transform_1(%arg0: i32) -> (i32, i32) {
    %c0_i32 = arith.constant 0 : i32
    %c0_i32_0 = arith.constant 0 : i32
    %c0_i32_1 = arith.constant 0 : i32
    return %c0_i32, %c0_i32_0 : i32, i32
  }
  func.func @transform_2(%arg0: i32) -> (i32, i32) {
    %c0_i32 = arith.constant 0 : i32
    %c0_i32_0 = arith.constant 0 : i32
    %c0_i32_1 = arith.constant 0 : i32
    return %c0_i32, %c0_i32_0 : i32, i32
  }
  func.func @transform_3(%arg0: i32) -> (i32, i32) {
    %c0_i32 = arith.constant 0 : i32
    %c0_i32_0 = arith.constant 0 : i32
    %c0_i32_1 = arith.constant 0 : i32
    return %c0_i32, %c0_i32_0 : i32, i32
  }
  func.func @transform_4(%arg0: i32) -> (i32, i32) {
    %c0_i32 = arith.constant 0 : i32
    %c0_i32_0 = arith.constant 0 : i32
    %c0_i32_1 = arith.constant 0 : i32
    return %c0_i32, %c0_i32_0 : i32, i32
  }
  func.func @transform_5(%arg0: i32) -> (i32, i32) {
    %c0_i32 = arith.constant 0 : i32
    %c0_i32_0 = arith.constant 0 : i32
    %c0_i32_1 = arith.constant 0 : i32
    return %c0_i32, %c0_i32_0 : i32, i32
  }
  func.func @transform_6(%arg0: i32) -> (i32, i32) {
    %c0_i32 = arith.constant 0 : i32
    %c0_i32_0 = arith.constant 0 : i32
    %c0_i32_1 = arith.constant 0 : i32
    return %c0_i32, %c0_i32_0 : i32, i32
  }
  func.func @transform_7(%arg0: i32) -> (i32, i32) {
    %c0_i32 = arith.constant 0 : i32
    %c0_i32_0 = arith.constant 0 : i32
    return %arg0, %c0_i32 : i32, i32
  }
}

</mosaic_0001>

<bundles_post_ra>
// kernel: tpu_custom_call.1
= control target key start
LH: loop header
LB: loop body
LE: loop exit
PB: predicated region body
PF: predicated region fallthrough
CT: control target
= control target key end

     0   :  { %12 = vsyncpa [#allocation3], 0  ;;  %s442_s0 = inlined_call_operand.hbm [shape: f32[8,32], index: 0, kind: input, shape index: {}]   ;;  %s443_s1 = inlined_call_operand.hbm [shape: f32[32,32], index: 1, kind: input, shape index: {}]   ;;  %s444_s2 = inlined_call_operand.vmem [shape: f32[1,32], index: 2, kind: input, shape index: {}]   ;;  %s445_s3 = inlined_call_operand.hbm [shape: f32[32,32], index: 3, kind: input, shape index: {}]   ;;  %s446_s4 = inlined_call_operand.vmem [shape: f32[1,32], index: 4, kind: input, shape index: {}]   ;;  %s447_s5 = inlined_call_operand.hbm [shape: f32[32,32], index: 5, kind: input, shape index: {}]   ;;  %s448_s6 = inlined_call_operand.vmem [shape: f32[1,32], index: 6, kind: input, shape index: {}]   ;;  %s449_s7 = inlined_call_operand.hbm [shape: f32[8,32], index: 7, kind: output, shape index: {}]  }
   0x1   :  { %13 = vsyncpa [#allocation6], 0 }
   0x2   :  { %14 = vsyncpa [#allocation9], 0  ;;  %s31_s26 = sshll.u32 %s443_s1, 4  ;;  %s32_s26 = int_to_ptr.hbm [resolvable:$true] %s31_s26 }
   0x3   :  { %15 = vsyncpa [#allocation4], 0  ;;  %s366_s27 = smov [#allocation5]   ;;  %s21_s8 = sshll.u32 %s442_s0, 4  ;;  %s22_s8 = int_to_ptr.hbm [resolvable:$true] %s21_s8 }
   0x4   :  { %s33_s28 = sshll.u32 %s366_s27, 4  ;;  %s367_s9 = smov 128   ;;  %s34_s28 = int_to_ptr.vmem [resolvable:$true] %s33_s28 }
   0x5   :  { %s368_s10 = smov 8   ;;  %s369_s11 = smov [#allocation2]  }
   0x6   :  { %39 = dma.hbm_to_vmem [thread:$0]  %s32_s26, 512, %s34_s28, [#allocation6], %s367_s9, %s367_s9, %s368_s10  }
   0x7   :  { %s23_s12 = sshll.u32 %s369_s11, 4  ;;  %s46_s15 = sshll.u32 %s445_s3, 4  ;;  %s24_s12 = int_to_ptr.vmem [resolvable:$true] %s23_s12  ;;  %s47_s15 = int_to_ptr.hbm [resolvable:$true] %s46_s15 }
   0x8   :  { %26 = dma.hbm_to_vmem [thread:$0]  %s22_s8, 128, %s24_s12, [#allocation3]  }
   0x9   :  { %s61_s17 = sshll.u32 %s447_s5, 4  ;;  %s370_s18 = smov [#allocation7]   ;;  %s62_s17 = int_to_ptr.hbm [resolvable:$true] %s61_s17 }
   0xa   :  { %s48_s19 = sshll.u32 %s370_s18, 4  ;;  %s371_s0 = smov [#allocation8]   ;;  %s49_s19 = int_to_ptr.vmem [resolvable:$true] %s48_s19 }
   0xb   :  { %54 = dma.hbm_to_vmem [thread:$0]  %s47_s15, 512, %s49_s19, [#allocation6], %s367_s9, %s367_s9, %s368_s10  }
   0xc   :  { %s63_s20 = sshll.u32 %s371_s0, 4  ;;  %s64_s20 = int_to_ptr.vmem [resolvable:$true] %s63_s20 }
   0xd   :  { %69 = dma.hbm_to_vmem [thread:$0]  %s62_s17, 512, %s64_s20, [#allocation9], %s367_s9, %s367_s9, %s368_s10  }
   0xe   :  { %358 = dma.done.wait [#allocation3], 128  }
   0xf   :  { %359 = vsyncadd [#allocation3], 4294967168 }
  0x10   :  { %360 = dma.done.wait [#allocation6], 1024  }
  0x11   :  { %361 = vsyncadd [#allocation6], 4294966272 }
  0x12   :  { %362 = dma.done.wait [#allocation9], 512  }
  0x13   :  { %363 = vsyncadd [#allocation9], 4294966784  ;;  %v92_v0 = vld [vmem:[#allocation5 + $0x18] sm:$0xff]  ;;  %v91_v1 = vld [vmem:[#allocation5 + $0x10] sm:$0xff]  ;;  %vm97_vm0 = vcmask 261120   ;;  %s211_s26 = sshll.u32 %s449_s7, 4  ;;  %s212_s26 = int_to_ptr.hbm [resolvable:$true] %s211_s26 }
  0x14   :  { %113 = vmatpush.msra.mxu0 %v92_v0  ;;  %v90_v2 = vld [vmem:[#allocation5 + $0x8] sm:$0xff]  ;;  %v89_v3 = vld [vmem:[#allocation5] sm:$0xff]  ;;  %v88_v4 = vld [vmem:[#allocation2] sm:$0xff] }
  0x15   :  { %v126_v5 = vld [vmem:[#allocation7 + $0x18] sm:$0xff]  ;;  %v125_v6 = vld [vmem:[#allocation7 + $0x10] sm:$0xff]  ;;  %v124_v7 = vld [vmem:[#allocation7 + $0x8] sm:$0xff] }
  0x16   :  { %114 = vmatpush.msra.mxu0 %v91_v1  ;;  %146 = vmatpush.msra.mxu1 %v126_v5  ;;  %v123_v8 = vld [vmem:[#allocation7] sm:$0xff]  ;;  %v233_v9 = vld [vmem:[%s444_s2] ss:$0 sm:$0xff]  ;;  %v158_v15 = vld [vmem:[#allocation8 + $0x10] sm:$0xff] }
  0x17   :  { %v159_v14 = vld [vmem:[#allocation8 + $0x18] sm:$0xff]  ;;  %v157_v16 = vld [vmem:[#allocation8 + $0x8] sm:$0xff]  ;;  %v156_v17 = vld [vmem:[#allocation8] sm:$0xff] }
  0x18   :  { %115 = vmatpush.msra.mxu0 %v90_v2  ;;  %147 = vmatpush.msra.mxu1 %v125_v6  ;;  %v234_v18 = vld [vmem:[%s446_s4] ss:$0 sm:$0xff]  ;;  %s372_s4 = smov [#allocation10]  }
  0x19   :  { %179 = vmatpush.msra.mxu2 %v159_v14  ;;  %v235_v23 = vld [vmem:[%s448_s6] ss:$0 sm:$0xff]  ;;  %s209_s6 = sshll.u32 %s372_s4, 4  ;;  %s210_s6 = int_to_ptr.vmem [resolvable:$true] %s209_s6 }
  0x1a   :  { %116 = vmatpush.msra.mxu0 %v89_v3  ;;  %148 = vmatpush.msra.mxu1 %v124_v7 }
  0x1b   :  { %223 = vmatmul.msk.f32.vlgmr.msra.gmra.mxu0 %vm97_vm0, %v88_v4  ;;  %180 = vmatpush.msra.mxu2 %v158_v15 }
  0x1c   :  { %149 = vmatpush.msra.mxu1 %v123_v8 }
  0x1d   :  { %181 = vmatpush.msra.mxu2 %v157_v16 }
  0x1f   :  { %182 = vmatpush.msra.mxu2 %v156_v17 }
  0x98   :  { %v118_v10 = vpop.f32.mrf.mxu0 }
  0x99   :  { %v119_v11 = vadd.f32 %v233_v9, %v118_v10 }
  0x9b   :  { %v121_v12 = vmul.f32 0.01, %v119_v11 }
  0x9d   :  { %v122_v13 = vmax.f32 %v119_v11, %v121_v12 }
  0x9f   :  { %224 = vmatmul.msk.f32.vlgmr.msra.gmra.mxu1 %vm97_vm0, %v122_v13 }
 0x11c   :  { %v151_v19 = vpop.f32.mrf.mxu1 }
 0x11d   :  { %v152_v20 = vadd.f32 %v234_v18, %v151_v19 }
 0x11f   :  { %v154_v21 = vmul.f32 0.01, %v152_v20 }
 0x121   :  { %v155_v22 = vmax.f32 %v152_v20, %v154_v21 }
 0x123   :  { %225 = vmatmul.msk.f32.vlgmr.msra.gmra.mxu2 %vm97_vm0, %v155_v22 }
 0x1a6   :  { %v184_v24 = vpop.f32.mrf.mxu2 }
 0x1a7   :  { %v185_v25 = vadd.f32 %v235_v23, %v184_v24 }
 0x1a9   :  { %v187_v26 = vmul.f32 %v185_v25, %v185_v25 }
 0x1ab   :  { %v188_v27 = vsel %vm97_vm0, %v187_v26, 0.0 }
 0x1ac   :  { %189 = vadd.xlane.f32.xlu0 %v188_v27 }
 0x21f   :  { %v190_v28 = vpop.xlane.xlu0 %189 }
 0x220   :  { %236 = vrsqrt.f32 %v190_v28  ;;  %vm197_vm2 = vweird.f32 %v190_v28 }
 0x226   :  { %v237_v29 = vpop.eup %236 }
 0x227   :  { %v192_v30 = vmul.f32 %v237_v29, %v190_v28  ;;  %vm198_vm1 = vweird.f32 %v237_v29 }
 0x228   :  { %vm199_vm3 = vmor %vm197_vm2, %vm198_vm1 }
 0x229   :  { %v193_v31 = vmul.f32 %v237_v29, %v192_v30 }
 0x22b   :  { %v194_v32 = vmul.f32 0.5, %v193_v31 }
 0x22d   :  { %v195_v33 = vsub.f32 1.5, %v194_v32 }
 0x22f   :  { %v196_v34 = vmul.f32 %v237_v29, %v195_v33 }
 0x231   :  { %v200_v35 = vsel %vm199_vm3, %v237_v29, %v196_v34 }
 0x232   :  { %v201_v36 = vmin.f32 %v200_v35, 1.0 }
 0x234   :  { %v202_v37 = vmul.f32 %v201_v36, %v185_v25 }
 0x236   :  { %203 = vst.msk [vmem:[#allocation10] sm:$0xff] %vm97_vm0, %v202_v37 }
 0x237   :  { %214 = dma.vmem_to_hbm [thread:$0]  %s210_s6, 128, %s212_s26, [#allocation4]  }
 0x238   :  { %364 = dma.done.wait [#allocation4], 128  }
 0x239   :  { %365 = vsyncadd [#allocation4], 4294967168 }
 0x23a   :  { %219 = vsyncpa [#allocation3], 1 }
 0x23b   :  { %220 = vsyncpa [#allocation6], 1 }
 0x23c   :  { %221 = vsyncpa [#allocation9], 1 }
 0x23d   :  { %222 = vsyncpa [#allocation4], 1 }

</bundles_post_ra>
